<compile_context>
chip_gen: v7x
topology: tpu7x:2x2x1
jax: 0.10.0
libtpu: 0.0.40
codegen_flags: <defaults>
</compile_context>

<pallas_src>
import functools
import math

import jax
import jax.numpy as jnp
from jax.experimental import pallas as pl
from jax.experimental.pallas import tpu as pltpu


_SMALL_TENSOR_BYTES = 2 * 1024 * 1024  # below this, one full-width step wins


# ---------------------------------------------------------------------------
# Kernels
# ---------------------------------------------------------------------------

def _lane_tiled_kernel(scales_ref, x1_ref, x2_ref, o_ref, *, t1_blocks):
    """Grid step (i, j): fake-quant one (tn, tl) slab and store it lane-dense.

    Output lane-tile j < t1_blocks comes from x1, otherwise from x2; the
    concat placement itself lives entirely in the output index_map.
    """
    j = pl.program_id(1)
    scale = scales_ref[0]      # 127 / amax  (precomputed in the wrapper)
    inv_scale = scales_ref[1]  # 1 / scale   (precomputed in the wrapper)

    def fq(x):
        xf = x.astype(jnp.float32)               # f32 fake-quant path
        q = jnp.clip(jnp.round(xf * scale), -128.0, 127.0)
        # NOTE: q * (1/scale) may differ from torch's q / scale by <= 1 ulp.
        return (q * inv_scale).astype(o_ref.dtype)

    @pl.when(j < t1_blocks)
    def _():
        o_ref[...] = fq(x1_ref[...])

    @pl.when(j >= t1_blocks)
    def _():
        o_ref[...] = fq(x2_ref[...])


def _fullwidth_kernel(scales_ref, x1_ref, x2_ref, o_ref, *, l1):
    """Row-tiled fallback / small-tensor fast path.

    Blocks span the full lane width; the concat offset is handled with static
    slices inside the block (only path used when the flattened lane dims share
    no multiple-of-128 divisor, or when the whole tensor is tiny).
    """
    scale = scales_ref[0]
    inv_scale = scales_ref[1]

    def fq(x):
        xf = x.astype(jnp.float32)
        q = jnp.clip(jnp.round(xf * scale), -128.0, 127.0)
        return (q * inv_scale).astype(o_ref.dtype)

    o_ref[:, :l1] = fq(x1_ref[...])
    o_ref[:, l1:] = fq(x2_ref[...])


# ---------------------------------------------------------------------------
# Tile selection
# ---------------------------------------------------------------------------

def _divisors(n):
    divs = set()
    i = 1
    while i * i <= n:
        if n % i == 0:
            divs.add(i)
            divs.add(n // i)
        i += 1
    return divs


def _vmem_budget_and_limit():
    """(scratch budget for live block-buffers, vmem_limit_bytes) per generation."""
    cap = None
    try:
        get_info = getattr(pltpu, "get_tpu_info", None)
        if get_info is not None:
            info = get_info()
            for attr in ("vmem_capacity_bytes", "vmem_size_bytes", "vmem_bytes"):
                cap = getattr(info, attr, None)
                if cap:
                    break
    except Exception:
        cap = None
    if cap and cap >= 100 * 1024 * 1024:
        # v5e / v6e: 128 MiB physical VMEM -> spend it on ~8 MiB blocks.
        return 48 * 1024 * 1024, 64 * 1024 * 1024
    # v7x (64 MiB physical) or unknown: stay conservative.
    return 26 * 1024 * 1024, 32 * 1024 * 1024


def _choose_tiles(N, L1, L2, itemsize, budget_bytes):
    """(tn, tl) for the lane-tiled path, or None if no multiple-of-128 lane
    tile divides both flattened lane extents (then the full-width path runs).

    Live VMEM per step ~= 6 block-buffers (x1 + x2 + out, double-buffered);
    blocks target 2-8 MiB to amortize the ~0.35 us fixed per-step overhead.
    """
    g = math.gcd(L1, L2)
    lane_divs = sorted((d for d in _divisors(g) if d % 128 == 0), reverse=True)
    if not lane_divs:
        return None

    target_elems = max(min(8 * 1024 * 1024, budget_bytes // 6) // itemsize,
                       8 * 128)

    sub_align = max(8, 32 // itemsize)          # 8 for f32, 16 bf16, 32 int8
    n_divs = sorted(_divisors(N), reverse=True)
    aligned_n = [d for d in n_divs if d % sub_align == 0]

    best = None
    for tn in aligned_n:
        for tl in lane_divs:                     # descending: first fit = widest
            if tn * tl <= target_elems:
                if best is None or tn * tl > best[0] * best[1]:
                    best = (tn, tl)
                break
    if best is not None:
        return best

    # No sublane-aligned row divisor: the full first dim is always a legal
    # block extent; take the widest lane tile that keeps the block in budget.
    for tl in lane_divs:
        if N * tl <= target_elems:
            return (N, tl)
    if N * lane_divs[-1] * itemsize * 6 <= budget_bytes:
        return (N, lane_divs[-1])

    # Last resort (pathological N): any divisor pair under the target.
    for tn in n_divs:
        for tl in lane_divs:
            if tn * tl <= target_elems:
                return (tn, tl)
    return None


def _choose_row_tile(N, L1, L2, itemsize, budget_bytes):
    """Row tile for the full-lane-width path; always a divisor of N, bounded
    by the VMEM budget (fixes the previous unbounded `tn = N` fallback)."""
    row_bytes = 2 * (L1 + L2) * itemsize              # x1 + x2 + out per row
    max_rows = max(budget_bytes // (2 * row_bytes), 1)  # 2x: double-buffering
    if N <= max_rows:
        return N
    sub_align = max(8, 32 // itemsize)
    divs = sorted(_divisors(N), reverse=True)
    for d in divs:
        if d <= max_rows and d % sub_align == 0:
            return d
    for d in divs:
        if d <= max_rows:
            return d
    return 1


# ---------------------------------------------------------------------------
# Wrapper
# ---------------------------------------------------------------------------

def quant_concat(x1, x2, amax, dimension=1):
    """QuantConcat.forward for two NCHW inputs, shared quantizer, concat dim=1."""
    assert dimension == 1, "kernel implements channel (dim=1) concat"
    N, C1, H, W = x1.shape
    N2, C2, H2, W2 = x2.shape
    assert (N, H, W) == (N2, H2, W2), "non-concat dims must match"
    assert x1.dtype == x2.dtype, "inputs must share a dtype"
    # TODO(synk): only per-tensor (scalar) amax is supported, matching the
    # module's single shared TensorQuantizer; per-channel amax is not handled.

    L1, L2 = C1 * H * W, C2 * H * W
    x1f = x1.reshape(N, L1)
    x2f = x2.reshape(N, L2)

    itemsize = jnp.dtype(x1.dtype).itemsize
    total_elems = N * (L1 + L2)
    total_bytes = total_elems * itemsize

    # Hoisted scalar quant parameters (no per-step divide in the kernel).
    amax_c = jnp.maximum(jnp.asarray(amax, jnp.float32).reshape(()),
                         jnp.finfo(jnp.float32).tiny)
    scale = 127.0 / amax_c
    inv_scale = 1.0 / scale
    scales = jnp.stack([scale, inv_scale]).astype(jnp.float32)

    budget, vmem_limit = _vmem_budget_and_limit()
    cost = pl.CostEstimate(
        flops=5 * total_elems,                     # mul, round, 2x clip, mul
        transcendentals=0,
        bytes_accessed=2 * total_bytes,            # read x1 + x2, write out
    )

    tiles = None
    if total_bytes > _SMALL_TENSOR_BYTES:
        tiles = _choose_tiles(N, L1, L2, itemsize, budget)

    if tiles is not None:
        # Main path: 2-D grid (row tiles x lane tiles of the OUTPUT), every
        # output store lane-dense and unmasked; the unused input's block index
        # is pinned so it is not re-DMA'd while the other input is active.
        tn, tl = tiles
        T1, T2 = L1 // tl, L2 // tl
        grid = (N // tn, T1 + T2)
        kernel = functools.partial(_lane_tiled_kernel, t1_blocks=T1)
        out_flat = pl.pallas_call(
            kernel,
            out_shape=jax.ShapeDtypeStruct((N, L1 + L2), x1.dtype),
            grid=grid,
            in_specs=[
                pl.BlockSpec(memory_space=pltpu.SMEM),                      # scales
                pl.BlockSpec((tn, tl), lambda i, j: (i, jnp.minimum(j, T1 - 1))),
                pl.BlockSpec((tn, tl), lambda i, j: (i, jnp.maximum(j - T1, 0))),
            ],
            out_specs=pl.BlockSpec((tn, tl), lambda i, j: (i, j)),
            compiler_params=pltpu.CompilerParams(
                # Every output tile is independent -> both axes parallel, so
                # v7x's two TensorCores are used even when N // tn == 1.
                dimension_semantics=("parallel", "parallel"),
                vmem_limit_bytes=vmem_limit,
            ),
            cost_estimate=cost,
        )(scales, x1f, x2f)
    else:
        # Small-tensor fast path (single step) or no shared multiple-of-128
        # lane tile: full-lane-width blocks, concat handled in-block.
        tn = _choose_row_tile(N, L1, L2, itemsize, budget)
        kernel = functools.partial(_fullwidth_kernel, l1=L1)
        out_flat = pl.pallas_call(
            kernel,
            out_shape=jax.ShapeDtypeStruct((N, L1 + L2), x1.dtype),
            grid=(N // tn,),
            in_specs=[
                pl.BlockSpec(memory_space=pltpu.SMEM),                      # scales
                pl.BlockSpec((tn, L1), lambda i: (i, 0)),
                pl.BlockSpec((tn, L2), lambda i: (i, 0)),
            ],
            out_specs=pl.BlockSpec((tn, L1 + L2), lambda i: (i, 0)),
            compiler_params=pltpu.CompilerParams(
                dimension_semantics=("parallel",),
                vmem_limit_bytes=vmem_limit,
            ),
            cost_estimate=cost,
        )(scales, x1f, x2f)

    return out_flat.reshape(N, C1 + C2, H, W)


# ---------------------------------------------------------------------------
# Reference + self-test
# ---------------------------------------------------------------------------

def _reference(x1, x2, amax):
    amax = jnp.maximum(jnp.asarray(amax, jnp.float32), jnp.finfo(jnp.float32).tiny)
    scale = 127.0 / amax

    def fq(x):
        q = jnp.clip(jnp.round(x.astype(jnp.float32) * scale), -128.0, 127.0)
        return (q / scale).astype(x.dtype)

    return jnp.concatenate([fq(x1), fq(x2)], axis=1)


if __name__ == "__main__":
    key = jax.random.PRNGKey(0)

    def run_case(case_id, shape1, shape2, dtype=jnp.float32):
        k1, k2 = jax.random.split(jax.random.fold_in(key, case_id))
        x1 = jax.random.normal(k1, shape1, dtype=dtype)
        x2 = jax.random.normal(k2, shape2, dtype=dtype)
        # TODO(synk): histogram-based calibration (collect/compute_amax) is a
        # host-side procedure with no clean Pallas equivalent; amax is treated
        # as a fixed post-calibration parameter.
        amax = jnp.maximum(jnp.max(jnp.abs(x1)), jnp.max(jnp.abs(x2)))
        out = quant_concat(x1, x2, amax, dimension=1)
        jax.block_until_ready(out)
        ref = _reference(x1, x2, amax)
        assert out.shape == ref.shape
        assert jnp.allclose(out, ref, atol=1e-5, rtol=1e-5), \
            f"mismatch vs reference for {shape1} / {shape2}"

    # Small-tensor fast path (single full-width step) — the module's test shape.
    run_case(1, (2, 4, 16, 16), (2, 4, 16, 16))
    # Lane-tiled 2-D-grid main path (concat offset on a lane-tile boundary).
    run_case(2, (8, 64, 32, 32), (8, 32, 32, 32))
    # Full-width path for shapes whose flattened lane dims share no 128-multiple.
    run_case(3, (2, 3, 14, 14), (2, 5, 14, 14))

    print("KERNEL_OK")
</pallas_src>

<mosaic_0001>
module attributes {stable_mosaic.version = 11 : i64} {
  func.func @_fullwidth_kernel(%arg0: i32, %arg1: memref<2xf32, #tpu.memory_space<smem>>, %arg2: memref<2x1024xf32, #tpu.memory_space<vmem>>, %arg3: memref<2x1024xf32, #tpu.memory_space<vmem>>, %arg4: memref<2x2048xf32, #tpu.memory_space<vmem>>) attributes {dimension_semantics = [#tpu.dimension_semantics<parallel>], iteration_bounds = array<i64: 1>, scalar_prefetch = 0 : i64, scratch_operands = 0 : i64, tpu.core_type = #tpu.core_type<tc>, window_params = [{transform_indices = @transform_0, window_bounds = array<i64: 2>}, {transform_indices = @transform_1, window_bounds = array<i64: 2, 1024>}, {transform_indices = @transform_2, window_bounds = array<i64: 2, 1024>}, {transform_indices = @transform_3, window_bounds = array<i64: 2, 2048>}]} {
    %c0 = arith.constant 0 : index
    %0 = memref.load %arg1[%c0] : memref<2xf32, #tpu.memory_space<smem>>
    %c1 = arith.constant 1 : index
    %1 = memref.load %arg1[%c1] : memref<2xf32, #tpu.memory_space<smem>>
    %c0_0 = arith.constant 0 : index
    %c0_1 = arith.constant 0 : index
    %2 = vector.load %arg2[%c0_0, %c0_1] : memref<2x1024xf32, #tpu.memory_space<vmem>>, vector<2x1024xf32>
    %3 = vector.broadcast %0 : f32 to vector<2x1024xf32>
    %4 = arith.mulf %2, %3 : vector<2x1024xf32>
    %5 = math.roundeven %4 : vector<2x1024xf32>
    %cst = arith.constant -1.280000e+02 : f32
    %cst_2 = arith.constant 1.270000e+02 : f32
    %6 = vector.broadcast %cst : f32 to vector<2x1024xf32>
    %7 = arith.maximumf %6, %5 : vector<2x1024xf32>
    %8 = vector.broadcast %cst_2 : f32 to vector<2x1024xf32>
    %9 = arith.minimumf %8, %7 : vector<2x1024xf32>
    %10 = vector.broadcast %1 : f32 to vector<2x1024xf32>
    %11 = arith.mulf %9, %10 : vector<2x1024xf32>
    %c0_3 = arith.constant 0 : index
    %c0_4 = arith.constant 0 : index
    %12 = vector.load %arg4[%c0_3, %c0_4] : memref<2x2048xf32, #tpu.memory_space<vmem>>, vector<2x1024xf32>
    tpu.vector_store %arg4[%c0_3, %c0_4], %11 {strides = array<i32>} : memref<2x2048xf32, #tpu.memory_space<vmem>>, vector<2x1024xf32>,
    %c0_5 = arith.constant 0 : index
    %c0_6 = arith.constant 0 : index
    %13 = vector.load %arg3[%c0_5, %c0_6] : memref<2x1024xf32, #tpu.memory_space<vmem>>, vector<2x1024xf32>
    %14 = vector.broadcast %0 : f32 to vector<2x1024xf32>
    %15 = arith.mulf %13, %14 : vector<2x1024xf32>
    %16 = math.roundeven %15 : vector<2x1024xf32>
    %cst_7 = arith.constant -1.280000e+02 : f32
    %cst_8 = arith.constant 1.270000e+02 : f32
    %17 = vector.broadcast %cst_7 : f32 to vector<2x1024xf32>
    %18 = arith.maximumf %17, %16 : vector<2x1024xf32>
    %19 = vector.broadcast %cst_8 : f32 to vector<2x1024xf32>
    %20 = arith.minimumf %19, %18 : vector<2x1024xf32>
    %21 = vector.broadcast %1 : f32 to vector<2x1024xf32>
    %22 = arith.mulf %20, %21 : vector<2x1024xf32>
    %c0_9 = arith.constant 0 : index
    %c1024 = arith.constant 1024 : index
    %23 = vector.load %arg4[%c0_9, %c1024] : memref<2x2048xf32, #tpu.memory_space<vmem>>, vector<2x1024xf32>
    tpu.vector_store %arg4[%c0_9, %c1024], %22 {strides = array<i32>} : memref<2x2048xf32, #tpu.memory_space<vmem>>, vector<2x1024xf32>,
    return
  }
  func.func @transform_0(%arg0: i32) -> i32 {
    %c0_i32 = arith.constant 0 : i32
    %c0_i32_0 = arith.constant 0 : i32
    return %c0_i32 : i32
  }
  func.func @transform_1(%arg0: i32) -> (i32, i32) {
    %c0_i32 = arith.constant 0 : i32
    %c0_i32_0 = arith.constant 0 : i32
    return %arg0, %c0_i32 : i32, i32
  }
  func.func @transform_2(%arg0: i32) -> (i32, i32) {
    %c0_i32 = arith.constant 0 : i32
    %c0_i32_0 = arith.constant 0 : i32
    return %arg0, %c0_i32 : i32, i32
  }
  func.func @transform_3(%arg0: i32) -> (i32, i32) {
    %c0_i32 = arith.constant 0 : i32
    %c0_i32_0 = arith.constant 0 : i32
    return %arg0, %c0_i32 : i32, i32
  }
}

</mosaic_0001>

<bundles_post_ra>
// kernel: tpu_custom_call.1
= control target key start
LH: loop header
LB: loop body
LE: loop exit
PB: predicated region body
PF: predicated region fallthrough
CT: control target
= control target key end

     0   :  { %8 = vsyncpa [#allocation5], 0  ;;  %s264_s0 = inlined_call_operand.hbm [shape: f32[2], index: 0, kind: input, shape index: {}]   ;;  %s265_s1 = inlined_call_operand.hbm [shape: f32[2,1024], index: 1, kind: input, shape index: {}]   ;;  %s266_s2 = inlined_call_operand.hbm [shape: f32[2,1024], index: 2, kind: input, shape index: {}]   ;;  %s267_s3 = inlined_call_operand.hbm [shape: f32[2,2048], index: 3, kind: output, shape index: {}]  }
   0x1   :  { %9 = vsyncpa [#allocation3], 0 }
   0x2   :  { %10 = vsyncpa [#allocation8], 0 }
   0x3   :  { %11 = vsyncpa [#allocation4], 0  ;;  %s108_s14 = scalar_lea.hbm %s264_s0, 16 }
   0x4   :  { %p109_p0 = scmp.ne.s32.totalorder %s264_s0, %s108_s14  ;;  %p112_p1 = scmp.lt.u32.totalorder %s108_s14, %s264_s0 }
   0x6   :  { %p114_p2 = pnand %p112_p1, %p109_p0 }
   0x8   :  { %117 = shalt.err (!%p114_p2)
}
   0x9   :  { %s192_s19 = smov [#allocation2]   ;;  %s193_s22 = smov [#allocation6]  }
   0xa   :  { %19 = dma.hbm_to_smem %s264_s0, 16, %s192_s19, [#allocation5]  }
   0xb   :  { %s26_s23 = sshll.u32 %s193_s22, 4  ;;  %s194_s24 = smov [#allocation7]   ;;  %s27_s23 = int_to_ptr.vmem [resolvable:$true] %s26_s23 }
   0xc   :  { %s36_s25 = sshll.u32 %s194_s24, 4  ;;  %s118_s28 = scalar_lea.hbm %s265_s1, 256  ;;  %s37_s25 = int_to_ptr.vmem [resolvable:$true] %s36_s25 }
   0xd   :  { %p119_p3 = scmp.ne.s32.totalorder %s265_s1, %s118_s28  ;;  %p122_p4 = scmp.lt.u32.totalorder %s118_s28, %s265_s1 }
   0xf   :  { %p124_p5 = pnand %p122_p4, %p119_p3 }
  0x11   :  { %127 = shalt.err (!%p124_p5)
}
  0x12   :  { %s128_s0 = scalar_lea.vmem %s27_s23, 256  ;;  %p133_p7 = scmp.lt.s32.totalorder %s27_s23, %s27_s23 }
  0x13   :  { %p129_p6 = scmp.ne.s32.totalorder %s27_s23, %s128_s0  ;;  %p134_p8 = scmp.lt.s32.totalorder %s128_s0, %s128_s0 }
  0x15   :  { %p135_p9 = por %p134_p8, %p133_p7 }
  0x17   :  { %p136_p10 = pnand %p135_p9, %p129_p6 }
  0x19   :  { %139 = shalt.err (!%p136_p10)
}
  0x1a   :  { %29 = dma.hbm_to_vmem [thread:$0]  %s265_s1, 256, %s27_s23, [#allocation3]  }
  0x1b   :  { %s140_s10 = scalar_lea.hbm %s266_s2, 256 }
  0x1c   :  { %p141_p11 = scmp.ne.s32.totalorder %s266_s2, %s140_s10  ;;  %p144_p12 = scmp.lt.u32.totalorder %s140_s10, %s266_s2 }
  0x1e   :  { %p146_p13 = pnand %p144_p12, %p141_p11 }
  0x20   :  { %149 = shalt.err (!%p146_p13)
}
  0x21   :  { %s150_s15 = scalar_lea.vmem %s37_s25, 256  ;;  %p155_p1 = scmp.lt.s32.totalorder %s37_s25, %s37_s25 }
  0x22   :  { %p151_p0 = scmp.ne.s32.totalorder %s37_s25, %s150_s15  ;;  %p156_p2 = scmp.lt.s32.totalorder %s150_s15, %s150_s15 }
  0x24   :  { %p157_p3 = por %p156_p2, %p155_p1 }
  0x26   :  { %p158_p4 = pnand %p157_p3, %p151_p0 }
  0x28   :  { %161 = shalt.err (!%p158_p4)
}
  0x29   :  { %39 = dma.hbm_to_vmem [thread:$0]  %s266_s2, 256, %s37_s25, [#allocation8]  }
  0x2a   :  { %184 = dma.done.wait [#allocation5], 16  }
  0x2b   :  { %185 = vsyncadd [#allocation5], 4294967280 }
  0x2c   :  { %186 = dma.done.wait [#allocation3], 256  }
  0x2d   :  { %187 = vsyncadd [#allocation3], 4294967040 }
  0x2e   :  { %188 = dma.done.wait [#allocation8], 256  }
  0x2f   :  { %189 = vsyncadd [#allocation8], 4294967040 }
  0x30   :  { %49 = sfence }
  0x31   :  { %s50_s17 = sld [smem:[#allocation2]]  ;;  %v52_v0 = vld [vmem:[#allocation6] sm:$0xff]  ;;  %s99_s18 = sld [smem:[#allocation2 + $0x1]]  ;;  %v53_v1 = vld [vmem:[#allocation6 + $0x8] sm:$0xff]  ;;  %v68_v2 = vld [vmem:[#allocation7] sm:$0xff] }
  0x32   :  { %v69_v3 = vld [vmem:[#allocation7 + $0x8] sm:$0xff]  ;;  %s195_s2 = smov [#allocation9]  }
  0x33   :  { %s88_s19 = sshll.u32 %s195_s2, 4  ;;  %s89_s19 = int_to_ptr.vmem [resolvable:$true] %s88_s19 }
  0x34   :  { %s162_s20 = scalar_lea.vmem %s89_s19, 512  ;;  %p167_p6 = scmp.lt.s32.totalorder %s89_s19, %s89_s19 }
  0x35   :  { %p163_p5 = scmp.ne.s32.totalorder %s89_s19, %s162_s20  ;;  %p168_p7 = scmp.lt.s32.totalorder %s162_s20, %s162_s20 }
  0x37   :  { %v54_v4 = vstv %s50_s17  ;;  %v63_v17 = vstv %s99_s18  ;;  %p169_p8 = por %p168_p7, %p167_p6 }
  0x38   :  { %v55_v5 = vmul.f32 %v54_v4, %v52_v0  ;;  %v56_v6 = vmul.f32 %v54_v4, %v53_v1  ;;  %v70_v7 = vmul.f32 %v68_v2, %v54_v4  ;;  %v71_v8 = vmul.f32 %v69_v3, %v54_v4 }
  0x39   :  { %p170_p9 = pnand %p169_p8, %p163_p5 }
  0x3a   :  { %v100_v9 = vround.rtne.f32 %v55_v5  ;;  %v101_v10 = vround.rtne.f32 %v56_v6  ;;  %v102_v11 = vround.rtne.f32 %v70_v7  ;;  %v103_v12 = vround.rtne.f32 %v71_v8 }
  0x3c   :  { %v59_v13 = vmax.f32 %v100_v9, -128.0  ;;  %v60_v14 = vmax.f32 %v101_v10, -128.0  ;;  %v74_v15 = vmax.f32 %v102_v11, -128.0  ;;  %v75_v16 = vmax.f32 %v103_v12, -128.0 }
  0x3e   :  { %v61_v18 = vmin.f32 %v59_v13, 127.0  ;;  %v62_v19 = vmin.f32 %v60_v14, 127.0  ;;  %v76_v20 = vmin.f32 %v74_v15, 127.0  ;;  %v77_v21 = vmin.f32 %v75_v16, 127.0 }
  0x40   :  { %v64_v22 = vmul.f32 %v63_v17, %v61_v18  ;;  %v65_v23 = vmul.f32 %v63_v17, %v62_v19  ;;  %v78_v24 = vmul.f32 %v76_v20, %v63_v17  ;;  %v79_v25 = vmul.f32 %v77_v21, %v63_v17 }
  0x42   :  { %66 = vst [vmem:[#allocation9] sm:$0xff] %v64_v22  ;;  %67 = vst [vmem:[#allocation9 + $0x8] sm:$0xff] %v65_v23 }
  0x43   :  { %80 = vst [vmem:[#allocation9 + $0x10] sm:$0xff] %v78_v24  ;;  %81 = vst [vmem:[#allocation9 + $0x18] sm:$0xff] %v79_v25 }
  0x44   :  { %173 = shalt.err (!%p170_p9)
}
  0x45   :  { %s174_s23 = scalar_lea.hbm %s267_s3, 512 }
  0x46   :  { %p175_p10 = scmp.ne.s32.totalorder %s267_s3, %s174_s23  ;;  %p178_p11 = scmp.lt.u32.totalorder %s174_s23, %s267_s3 }
  0x48   :  { %p180_p12 = pnand %p178_p11, %p175_p10 }
  0x4a   :  { %183 = shalt.err (!%p180_p12)
}
  0x4b   :  { %91 = dma.vmem_to_hbm [thread:$0]  %s89_s19, 512, %s267_s3, [#allocation4]  }
  0x4c   :  { %190 = dma.done.wait [#allocation4], 512  }
  0x4d   :  { %191 = vsyncadd [#allocation4], 4294966784 }
  0x4e   :  { %95 = vsyncpa [#allocation3], 1 }
  0x4f   :  { %96 = vsyncpa [#allocation8], 1 }
  0x50   :  { %97 = vsyncpa [#allocation4], 1 }
  0x51   :  { %98 = vsyncpa [#allocation5], 1 }

</bundles_post_ra>
